<compile_context>
chip_gen: v7x
topology: tpu7x:2x2x1
jax: 0.10.0
libtpu: 0.0.40
codegen_flags: <defaults>
</compile_context>

<pallas_src>
import jax
import jax.numpy as jnp
import numpy as np
from jax.experimental import pallas as pl
from jax.experimental.pallas import tpu as pltpu

MAXIMUM_TLU_BIT_WIDTH = 16
_LANE = 128      # lane width (last dim)
_SUBLANE = 8     # sublane width (second-to-last dim)


def _round_up(x, m):
    return ((x + m - 1) // m) * m


# ---------------------------------------------------------------------------
# Fused Pallas kernel: all n_layers of (quantize -> integer matmul -> scale+bias -> ReLU)
# ---------------------------------------------------------------------------
def _make_fused_kernel(n_layers, n_a_bits):
    qmax = float(2 ** (n_a_bits - 1) - 1)
    qmin = -float(2 ** (n_a_bits - 1))

    def kernel(scal_ref, x_ref, *refs):
        # refs = (w0, b0, w1, b1, ..., w_{L-1}, b_{L-1}, o_ref)
        o_ref = refs[-1]
        wb_refs = refs[:-1]

        # Carried activation, already scaled into layer-0 quantization units.
        g = x_ref[...].astype(jnp.float32) * scal_ref[0]

        for idx in range(n_layers):
            w_ref = wb_refs[2 * idx]       # bf16 [in_pad, out_pad]  (integer weight codes)
            b_ref = wb_refs[2 * idx + 1]   # f32  [1, out_pad]       (bias pre-scaled by 1/s_next)

            # QuantIdentity: integer-domain activation quantization (scale already folded in).
            q = jnp.clip(jnp.round(g), qmin, qmax)

            # QuantLinear: exact integer matmul on the MXU (codes exact in bf16, sums < 2^24).
            acc = jnp.dot(q.astype(jnp.bfloat16), w_ref[...],
                          preferred_element_type=jnp.float32)

            # Epilogue: one fused scale (act*weight scale folded with next layer's 1/act_scale)
            # plus pre-scaled bias; ReLU on every layer except the last.
            z = acc * scal_ref[1 + idx] + b_ref[...]
            g = jnp.maximum(z, 0.0) if idx < n_layers - 1 else z

        o_ref[...] = g.astype(o_ref.dtype)

    return kernel


def sparse_quant_nn_forward(x, qparams, *, n_a_bits, batch_tile=None, out_dtype=jnp.float32):
    """Run the fused QNN forward pass. Returns [batch, n_outputs] (out_dtype, default f32)."""
    w_codes = qparams["w_codes"]   # list of [in_pad, out_pad] bf16 weight codes (padded)
    biases = qparams["biases"]     # list of [1, out_pad] f32 pre-scaled biases (padded)
    scal = qparams["scal"]         # [n_layers + 1] f32: [1/s_x0, post_0, ..., post_{L-1}]
    n_layers = len(w_codes)

    batch, in_dim = x.shape
    in_pad = w_codes[0].shape[0]
    out_pad_last = w_codes[-1].shape[1]

    # Batch tiling: big tiles amortize per-grid-step overhead; ensure >= 2 grid steps whenever
    # the batch allows so the "parallel" axis actually shards across v7x's two TensorCores.
    if batch_tile is None:
        batch_tile = min(512, _round_up(batch, _SUBLANE))
    batch_tile = max(_SUBLANE, _round_up(batch_tile, _SUBLANE))
    b_pad = _round_up(batch, batch_tile)
    if b_pad // batch_tile < 2 and batch_tile >= 2 * _SUBLANE:
        batch_tile = _round_up(batch_tile // 2, _SUBLANE)
        b_pad = _round_up(batch, batch_tile)

    # bf16 input halves the streamed HBM bytes (first op is a 3-bit quantize); the feature dim
    # keeps its sublane-aligned true width -- the block covers the full last dim, so it does
    # not need to be a multiple of 128.  Padded rows/cols are exact zeros.
    x_pad = jnp.zeros((b_pad, in_pad), jnp.bfloat16).at[:batch, :in_dim].set(
        x.astype(jnp.bfloat16))

    kernel = _make_fused_kernel(n_layers, n_a_bits)

    # Batch-tiled x / output; weights & biases resident at block (0, 0) across the grid.
    in_specs = [pl.BlockSpec((batch_tile, in_pad), lambda i, s: (i, 0))]
    operands = [x_pad]
    for w, b in zip(w_codes, biases):
        in_specs.append(pl.BlockSpec(w.shape, lambda i, s: (0, 0)))
        in_specs.append(pl.BlockSpec(b.shape, lambda i, s: (0, 0)))
        operands.extend([w, b])

    # Explicit VMEM budget: resident weights/biases (x2 buffering) + double-buffered I/O tiles
    # + slack for in-kernel intermediates.
    weight_bytes = sum(int(np.prod(w.shape)) * 2 + int(np.prod(b.shape)) * 4
                       for w, b in zip(w_codes, biases))
    io_bytes = 2 * batch_tile * (in_pad * 2 + out_pad_last * 4)
    vmem_limit = int(min(48 << 20, max(16 << 20, 2 * weight_bytes + io_bytes + (8 << 20))))

    out = pl.pallas_call(
        kernel,
        out_shape=jax.ShapeDtypeStruct((b_pad, out_pad_last), out_dtype),
        grid_spec=pltpu.PrefetchScalarGridSpec(
            num_scalar_prefetch=1,                 # per-tensor scales -> SMEM
            grid=(b_pad // batch_tile,),
            in_specs=in_specs,
            out_specs=pl.BlockSpec((batch_tile, out_pad_last), lambda i, s: (i, 0)),
        ),
        compiler_params=pltpu.CompilerParams(
            dimension_semantics=(pltpu.PARALLEL,),  # batch axis shards across TCs on v7x
            vmem_limit_bytes=vmem_limit,
        ),
    )(scal, *operands)

    return out[:batch, : qparams["n_outputs"]]


# ---------------------------------------------------------------------------
# Parameter preparation (plain JAX glue): pruning + weight quantization + scale folding + padding
# ---------------------------------------------------------------------------
def max_active_neurons(n_accum_bits, n_w_bits, n_a_bits):
    return int(np.floor((2 ** n_accum_bits - 1) / (2 ** n_w_bits - 1) / (2 ** n_a_bits - 1)))


def prune_l1_unstructured(w, n_prune):
    """Zero exactly the n_prune smallest-magnitude weights (rank-based, like torch prune)."""
    if n_prune <= 0:
        return w
    flat = jnp.abs(w).reshape(-1)
    order = jnp.argsort(flat)                       # ascending |w|
    mask = jnp.ones(flat.shape, w.dtype).at[order[:n_prune]].set(0.0)
    return w * mask.reshape(w.shape)


def quantize_weight(w, n_w_bits):
    """Symmetric narrow-range per-tensor weight quantization -> (integer codes, scale)."""
    # TODO(synk): verify narrow_range matches the brevitas weight-quantizer config in use.
    qmax = float(2 ** (n_w_bits - 1) - 1)
    scale = jnp.maximum(jnp.max(jnp.abs(w)) / qmax, 1e-12)
    codes = jnp.clip(jnp.round(w / scale), -qmax, qmax)
    return codes, scale


def init_qnn_params(key, input_dim, n_layers, n_outputs, n_hidden_neurons_multiplier=4,
                    n_w_bits=3, n_a_bits=3, n_accum_bits=MAXIMUM_TLU_BIT_WIDTH):
    """Build padded kernel params + an unpadded copy for the pure-JAX reference."""
    max_act = max_active_neurons(n_accum_bits, n_w_bits, n_a_bits)
    if max_act == 0:
        raise ValueError("accumulator bitwidth too low for requested quantization")

    a_absmax = 2 ** (n_a_bits - 1)
    w_absmax = 2 ** (n_w_bits - 1) - 1
    if a_absmax > 256 or w_absmax > 256:
        raise ValueError("quantization codes too wide for the exact bf16 MXU path")

    # Deterministic stand-in for the brevitas learned per-tensor activation scale (~[-3, 3]).
    # TODO(synk): the learned (trained) QuantIdentity scale has no forward-only equivalent here.
    s_x = [np.float32(3.0 / (2 ** (n_a_bits - 1) - 1))] * n_layers
    inv_sx = [np.float32(1.0) / s for s in s_x]

    w_codes_pad, biases_pad, ref_layers = [], [], []
    scal_vals = [inv_sx[0]]

    in_features = input_dim
    in_pad = _round_up(input_dim, _SUBLANE)   # layer-0 K: sublane-aligned only, not lane-padded
    for idx in range(n_layers):
        out_features = (n_outputs if idx == n_layers - 1
                        else input_dim * n_hidden_neurons_multiplier)
        key, kw, kb = jax.random.split(key, 3)
        w = jax.random.normal(kw, (out_features, in_features), jnp.float32) / np.sqrt(in_features)
        b = jax.random.normal(kb, (1, out_features), jnp.float32) * 0.01

        # enable_pruning(): only layers wider than max_active_neurons get pruned.
        if out_features > max_act:
            w = prune_l1_unstructured(w, (out_features - max_act) * in_features)

        # bf16-code exactness bound: every f32 partial sum of the integer matmul stays exact.
        assert in_features * a_absmax * w_absmax < 2 ** 24, "raise of bit widths breaks exactness"

        codes, s_w = quantize_weight(w, n_w_bits)
        codes_t = jnp.transpose(codes)                      # [in, out] so the kernel does x @ W

        comb = np.float32(s_x[idx]) * s_w                   # act_scale * weight_scale
        if idx < n_layers - 1:
            # Fold comb and the next layer's 1/act_scale through the ReLU (both positive):
            #   relu(acc*c + b) * inv == relu(acc*(c*inv) + b*inv)
            scal_vals.append(comb * inv_sx[idx + 1])
            b_eff = b * inv_sx[idx + 1]
        else:
            scal_vals.append(comb)
            b_eff = b

        out_pad = _round_up(out_features, _LANE)            # lane-dense activations / output
        w_pad = (jnp.zeros((in_pad, out_pad), jnp.float32)
                 .at[:in_features, :out_features].set(codes_t))
        b_pad = jnp.zeros((1, out_pad), jnp.float32).at[:, :out_features].set(b_eff)

        w_codes_pad.append(w_pad.astype(jnp.bfloat16))
        biases_pad.append(b_pad)
        ref_layers.append((codes_t, b_eff))

        in_features, in_pad = out_features, out_pad

    qparams = dict(
        w_codes=w_codes_pad,
        biases=biases_pad,
        scal=jnp.stack([jnp.asarray(v, jnp.float32) for v in scal_vals]),
        n_outputs=n_outputs,
    )
    return qparams, ref_layers


# ---------------------------------------------------------------------------
# Pure-JAX reference (same math as the kernel; the scale folding is algebraically identical
# to the module's per-layer fake-quant form since all scales are positive and commute w/ ReLU).
# ---------------------------------------------------------------------------
def _reference_forward(x, ref_layers, scal, *, n_a_bits):
    qmax = float(2 ** (n_a_bits - 1) - 1)
    qmin = -float(2 ** (n_a_bits - 1))
    n_layers = len(ref_layers)
    g = x.astype(jnp.bfloat16).astype(jnp.float32) * scal[0]
    for idx, (codes_t, b_eff) in enumerate(ref_layers):
        q = jnp.clip(jnp.round(g), qmin, qmax)
        acc = jnp.dot(q.astype(jnp.bfloat16), codes_t.astype(jnp.bfloat16),
                      preferred_element_type=jnp.float32)
        z = acc * scal[1 + idx] + b_eff
        g = jnp.maximum(z, 0.0) if idx < n_layers - 1 else z
    return g


if __name__ == "__main__":
    # Module-consistent small configuration:
    #   input_dim=16, n_layers=3, n_outputs=4, n_hidden_neurons_multiplier=4
    #   -> hidden widths 64, 64, final 4.
    input_dim, n_layers, n_outputs = 16, 3, 4
    n_w_bits, n_a_bits = 3, 3

    key = jax.random.PRNGKey(0)
    key, kdata = jax.random.split(key)

    qparams, ref_layers = init_qnn_params(
        key, input_dim, n_layers, n_outputs,
        n_hidden_neurons_multiplier=4,
        n_w_bits=n_w_bits, n_a_bits=n_a_bits,
        n_accum_bits=MAXIMUM_TLU_BIT_WIDTH,
    )

    # Two batch sizes: single-tile path and the multi-tile (>=2 parallel grid steps) path.
    for batch in (8, 256):
        kdata, kx = jax.random.split(kdata)
        x = jax.random.normal(kx, (batch, input_dim), jnp.float32)

        out = jax.block_until_ready(sparse_quant_nn_forward(x, qparams, n_a_bits=n_a_bits))
        ref = _reference_forward(x, ref_layers, qparams["scal"], n_a_bits=n_a_bits)
        np.testing.assert_allclose(np.asarray(out), np.asarray(ref), rtol=1e-5, atol=1e-5)

    print("KERNEL_OK")
</pallas_src>

<mosaic_0001>
module attributes {stable_mosaic.version = 11 : i64} {
  func.func @kernel(%arg0: i32, %arg1: memref<4xf32, #tpu.memory_space<smem>>, %arg2: memref<8x16xbf16, #tpu.memory_space<vmem>>, %arg3: memref<16x128xbf16, #tpu.memory_space<vmem>>, %arg4: memref<1x128xf32, #tpu.memory_space<vmem>>, %arg5: memref<128x128xbf16, #tpu.memory_space<vmem>>, %arg6: memref<1x128xf32, #tpu.memory_space<vmem>>, %arg7: memref<128x128xbf16, #tpu.memory_space<vmem>>, %arg8: memref<1x128xf32, #tpu.memory_space<vmem>>, %arg9: memref<8x128xf32, #tpu.memory_space<vmem>>) attributes {dimension_semantics = [#tpu.dimension_semantics<parallel>], iteration_bounds = array<i64: 1>, scalar_prefetch = 1 : i64, scratch_operands = 0 : i64, tpu.core_type = #tpu.core_type<tc>, window_params = [{transform_indices = @transform_0, window_bounds = array<i64: 8, 16>}, {pipeline_mode = #tpu.pipeline_mode<synchronous>, transform_indices = @transform_1, window_bounds = array<i64: 16, 128>}, {pipeline_mode = #tpu.pipeline_mode<synchronous>, transform_indices = @transform_2, window_bounds = array<i64: 1, 128>}, {pipeline_mode = #tpu.pipeline_mode<synchronous>, transform_indices = @transform_3, window_bounds = array<i64: 128, 128>}, {pipeline_mode = #tpu.pipeline_mode<synchronous>, transform_indices = @transform_4, window_bounds = array<i64: 1, 128>}, {pipeline_mode = #tpu.pipeline_mode<synchronous>, transform_indices = @transform_5, window_bounds = array<i64: 128, 128>}, {pipeline_mode = #tpu.pipeline_mode<synchronous>, transform_indices = @transform_6, window_bounds = array<i64: 1, 128>}, {transform_indices = @transform_7, window_bounds = array<i64: 8, 128>}]} {
    %c0 = arith.constant 0 : index
    %c0_0 = arith.constant 0 : index
    %0 = vector.load %arg2[%c0, %c0_0] : memref<8x16xbf16, #tpu.memory_space<vmem>>, vector<8x16xbf16>
    %1 = arith.extf %0 : vector<8x16xbf16> to vector<8x16xf32>
    %c0_1 = arith.constant 0 : index
    %2 = memref.load %arg1[%c0_1] : memref<4xf32, #tpu.memory_space<smem>>
    %3 = vector.broadcast %2 : f32 to vector<8x16xf32>
    %4 = arith.mulf %1, %3 : vector<8x16xf32>
    %5 = math.roundeven %4 : vector<8x16xf32>
    %cst = arith.constant -4.000000e+00 : f32
    %cst_2 = arith.constant 3.000000e+00 : f32
    %6 = vector.broadcast %cst : f32 to vector<8x16xf32>
    %7 = arith.maximumf %6, %5 : vector<8x16xf32>
    %8 = vector.broadcast %cst_2 : f32 to vector<8x16xf32>
    %9 = arith.minimumf %8, %7 : vector<8x16xf32>
    %10 = arith.truncf %9 : vector<8x16xf32> to vector<8x16xbf16>
    %c0_3 = arith.constant 0 : index
    %c0_4 = arith.constant 0 : index
    %11 = vector.load %arg3[%c0_3, %c0_4] : memref<16x128xbf16, #tpu.memory_space<vmem>>, vector<16x128xbf16>
    %cst_5 = arith.constant dense<0.000000e+00> : vector<8x128xf32>
    %12 = tpu.matmul %10, %11, %cst_5 {dimension_numbers = #tpu.dot_dimension_numbers<[1], [0], [0], [1], [0, 0, 1, 1], [], []>} : vector<8x16xbf16>, vector<16x128xbf16>, vector<8x128xf32> -> vector<8x128xf32>
    %c1 = arith.constant 1 : index
    %13 = memref.load %arg1[%c1] : memref<4xf32, #tpu.memory_space<smem>>
    %14 = vector.broadcast %13 : f32 to vector<8x128xf32>
    %15 = arith.mulf %12, %14 : vector<8x128xf32>
    %c0_6 = arith.constant 0 : index
    %c0_7 = arith.constant 0 : index
    %16 = vector.load %arg4[%c0_6, %c0_7] : memref<1x128xf32, #tpu.memory_space<vmem>>, vector<1x128xf32>
    %17 = vector.broadcast %16 : vector<1x128xf32> to vector<8x128xf32>
    %18 = arith.addf %15, %17 : vector<8x128xf32>
    %cst_8 = arith.constant 0.000000e+00 : f32
    %19 = vector.broadcast %cst_8 : f32 to vector<8x128xf32>
    %20 = arith.maximumf %18, %19 : vector<8x128xf32>
    %21 = math.roundeven %20 : vector<8x128xf32>
    %cst_9 = arith.constant -4.000000e+00 : f32
    %cst_10 = arith.constant 3.000000e+00 : f32
    %22 = vector.broadcast %cst_9 : f32 to vector<8x128xf32>
    %23 = arith.maximumf %22, %21 : vector<8x128xf32>
    %24 = vector.broadcast %cst_10 : f32 to vector<8x128xf32>
    %25 = arith.minimumf %24, %23 : vector<8x128xf32>
    %26 = arith.truncf %25 : vector<8x128xf32> to vector<8x128xbf16>
    %c0_11 = arith.constant 0 : index
    %c0_12 = arith.constant 0 : index
    %27 = vector.load %arg5[%c0_11, %c0_12] : memref<128x128xbf16, #tpu.memory_space<vmem>>, vector<128x128xbf16>
    %cst_13 = arith.constant dense<0.000000e+00> : vector<8x128xf32>
    %28 = tpu.matmul %26, %27, %cst_13 {dimension_numbers = #tpu.dot_dimension_numbers<[1], [0], [0], [1], [0, 0, 1, 1], [], []>} : vector<8x128xbf16>, vector<128x128xbf16>, vector<8x128xf32> -> vector<8x128xf32>
    %c2 = arith.constant 2 : index
    %29 = memref.load %arg1[%c2] : memref<4xf32, #tpu.memory_space<smem>>
    %30 = vector.broadcast %29 : f32 to vector<8x128xf32>
    %31 = arith.mulf %28, %30 : vector<8x128xf32>
    %c0_14 = arith.constant 0 : index
    %c0_15 = arith.constant 0 : index
    %32 = vector.load %arg6[%c0_14, %c0_15] : memref<1x128xf32, #tpu.memory_space<vmem>>, vector<1x128xf32>
    %33 = vector.broadcast %32 : vector<1x128xf32> to vector<8x128xf32>
    %34 = arith.addf %31, %33 : vector<8x128xf32>
    %cst_16 = arith.constant 0.000000e+00 : f32
    %35 = vector.broadcast %cst_16 : f32 to vector<8x128xf32>
    %36 = arith.maximumf %34, %35 : vector<8x128xf32>
    %37 = math.roundeven %36 : vector<8x128xf32>
    %cst_17 = arith.constant -4.000000e+00 : f32
    %cst_18 = arith.constant 3.000000e+00 : f32
    %38 = vector.broadcast %cst_17 : f32 to vector<8x128xf32>
    %39 = arith.maximumf %38, %37 : vector<8x128xf32>
    %40 = vector.broadcast %cst_18 : f32 to vector<8x128xf32>
    %41 = arith.minimumf %40, %39 : vector<8x128xf32>
    %42 = arith.truncf %41 : vector<8x128xf32> to vector<8x128xbf16>
    %c0_19 = arith.constant 0 : index
    %c0_20 = arith.constant 0 : index
    %43 = vector.load %arg7[%c0_19, %c0_20] : memref<128x128xbf16, #tpu.memory_space<vmem>>, vector<128x128xbf16>
    %cst_21 = arith.constant dense<0.000000e+00> : vector<8x128xf32>
    %44 = tpu.matmul %42, %43, %cst_21 {dimension_numbers = #tpu.dot_dimension_numbers<[1], [0], [0], [1], [0, 0, 1, 1], [], []>} : vector<8x128xbf16>, vector<128x128xbf16>, vector<8x128xf32> -> vector<8x128xf32>
    %c3 = arith.constant 3 : index
    %45 = memref.load %arg1[%c3] : memref<4xf32, #tpu.memory_space<smem>>
    %46 = vector.broadcast %45 : f32 to vector<8x128xf32>
    %47 = arith.mulf %44, %46 : vector<8x128xf32>
    %c0_22 = arith.constant 0 : index
    %c0_23 = arith.constant 0 : index
    %48 = vector.load %arg8[%c0_22, %c0_23] : memref<1x128xf32, #tpu.memory_space<vmem>>, vector<1x128xf32>
    %49 = vector.broadcast %48 : vector<1x128xf32> to vector<8x128xf32>
    %50 = arith.addf %47, %49 : vector<8x128xf32>
    %c0_24 = arith.constant 0 : index
    %c0_25 = arith.constant 0 : index
    %51 = vector.load %arg9[%c0_24, %c0_25] : memref<8x128xf32, #tpu.memory_space<vmem>>, vector<8x128xf32>
    tpu.vector_store %arg9[%c0_24, %c0_25], %50 {strides = array<i32>} : memref<8x128xf32, #tpu.memory_space<vmem>>, vector<8x128xf32>,
    return
  }
  func.func @transform_0(%arg0: i32, %arg1: memref<4xf32, #tpu.memory_space<smem>>) -> (i32, i32) {
    %c0_i32 = arith.constant 0 : i32
    %c0_i32_0 = arith.constant 0 : i32
    return %arg0, %c0_i32 : i32, i32
  }
  func.func @transform_1(%arg0: i32, %arg1: memref<4xf32, #tpu.memory_space<smem>>) -> (i32, i32) {
    %c0_i32 = arith.constant 0 : i32
    %c0_i32_0 = arith.constant 0 : i32
    %c0_i32_1 = arith.constant 0 : i32
    return %c0_i32, %c0_i32_0 : i32, i32
  }
  func.func @transform_2(%arg0: i32, %arg1: memref<4xf32, #tpu.memory_space<smem>>) -> (i32, i32) {
    %c0_i32 = arith.constant 0 : i32
    %c0_i32_0 = arith.constant 0 : i32
    %c0_i32_1 = arith.constant 0 : i32
    return %c0_i32, %c0_i32_0 : i32, i32
  }
  func.func @transform_3(%arg0: i32, %arg1: memref<4xf32, #tpu.memory_space<smem>>) -> (i32, i32) {
    %c0_i32 = arith.constant 0 : i32
    %c0_i32_0 = arith.constant 0 : i32
    %c0_i32_1 = arith.constant 0 : i32
    return %c0_i32, %c0_i32_0 : i32, i32
  }
  func.func @transform_4(%arg0: i32, %arg1: memref<4xf32, #tpu.memory_space<smem>>) -> (i32, i32) {
    %c0_i32 = arith.constant 0 : i32
    %c0_i32_0 = arith.constant 0 : i32
    %c0_i32_1 = arith.constant 0 : i32
    return %c0_i32, %c0_i32_0 : i32, i32
  }
  func.func @transform_5(%arg0: i32, %arg1: memref<4xf32, #tpu.memory_space<smem>>) -> (i32, i32) {
    %c0_i32 = arith.constant 0 : i32
    %c0_i32_0 = arith.constant 0 : i32
    %c0_i32_1 = arith.constant 0 : i32
    return %c0_i32, %c0_i32_0 : i32, i32
  }
  func.func @transform_6(%arg0: i32, %arg1: memref<4xf32, #tpu.memory_space<smem>>) -> (i32, i32) {
    %c0_i32 = arith.constant 0 : i32
    %c0_i32_0 = arith.constant 0 : i32
    %c0_i32_1 = arith.constant 0 : i32
    return %c0_i32, %c0_i32_0 : i32, i32
  }
  func.func @transform_7(%arg0: i32, %arg1: memref<4xf32, #tpu.memory_space<smem>>) -> (i32, i32) {
    %c0_i32 = arith.constant 0 : i32
    %c0_i32_0 = arith.constant 0 : i32
    return %arg0, %c0_i32 : i32, i32
  }
}

</mosaic_0001>

<bundles_post_ra>
// kernel: tpu_custom_call.1
= control target key start
LH: loop header
LB: loop body
LE: loop exit
PB: predicated region body
PF: predicated region fallthrough
CT: control target
= control target key end

     0   :  { %s834_s0 = inlined_call_operand.hbm [shape: f32[4], index: 0, kind: input, shape index: {}]   ;;  %s835_s1 = inlined_call_operand.hbm [shape: bf16[8,16], index: 1, kind: input, shape index: {}]   ;;  %s836_s2 = inlined_call_operand.hbm [shape: bf16[16,128], index: 2, kind: input, shape index: {}]   ;;  %s837_s3 = inlined_call_operand.vmem [shape: f32[1,128], index: 3, kind: input, shape index: {}]   ;;  %s838_s4 = inlined_call_operand.hbm [shape: bf16[128,128], index: 4, kind: input, shape index: {}]   ;;  %s839_s5 = inlined_call_operand.vmem [shape: f32[1,128], index: 5, kind: input, shape index: {}]   ;;  %s840_s6 = inlined_call_operand.hbm [shape: bf16[128,128], index: 6, kind: input, shape index: {}]   ;;  %s841_s7 = inlined_call_operand.vmem [shape: f32[1,128], index: 7, kind: input, shape index: {}]   ;;  %s842_s8 = inlined_call_operand.hbm [shape: f32[8,128], index: 8, kind: output, shape index: {}]  }
   0x1   :  { %s536_s29 = scalar_lea.hbm %s834_s0, 16 }
   0x2   :  { %p537_p0 = scmp.ne.s32.totalorder %s834_s0, %s536_s29  ;;  %p540_p1 = scmp.lt.u32.totalorder %s536_s29, %s834_s0 }
   0x4   :  { %p542_p2 = pnand %p540_p1, %p537_p0 }
   0x6   :  { %545 = shalt.err (!%p542_p2)  }
   0x7   :  { %s666_s12 = smov [#allocation3]  }
   0x8   :  { %14 = dma.hbm_to_smem %s834_s0, 16, %s666_s12, [#allocation2] }
   0x9   :  { %656 = dma.done.wait [#allocation2], 16 }
   0xa   :  { %657 = vsyncadd [#allocation2], 4294967280 }
   0xb   :  { %16 = sfence }
   0xc   :  { %17 = vsyncpa [#allocation5], 0 }
   0xd   :  { %18 = vsyncpa [#allocation8], 0 }
   0xe   :  { %19 = vsyncpa [#allocation11], 0 }
   0xf   :  { %20 = vsyncpa [#allocation6], 0  ;;  %s667_s15 = smov [#allocation7]   ;;  %s546_s19 = scalar_lea.hbm %s836_s2, 128 }
  0x10   :  { %s36_s16 = sshll.u32 %s667_s15, 4  ;;  %p547_p3 = scmp.ne.s32.totalorder %s836_s2, %s546_s19  ;;  %s37_s16 = int_to_ptr.vmem [resolvable:$true] %s36_s16 }
  0x11   :  { %p550_p4 = scmp.lt.u32.totalorder %s546_s19, %s836_s2 }
  0x13   :  { %p552_p5 = pnand %p550_p4, %p547_p3 }
  0x15   :  { %555 = shalt.err (!%p552_p5)
}
  0x16   :  { %s556_s23 = scalar_lea.vmem %s37_s16, 128  ;;  %p561_p7 = scmp.lt.s32.totalorder %s37_s16, %s37_s16 }
  0x17   :  { %p557_p6 = scmp.ne.s32.totalorder %s37_s16, %s556_s23  ;;  %p562_p8 = scmp.lt.s32.totalorder %s556_s23, %s556_s23 }
  0x19   :  { %p563_p9 = por %p562_p8, %p561_p7 }
  0x1b   :  { %p564_p10 = pnand %p563_p9, %p557_p6 }
  0x1d   :  { %567 = shalt.err (!%p564_p10)
}
  0x1e   :  { %s668_s24 = smov 64   ;;  %s669_s25 = smov 4  }
  0x1f   :  { %42 = dma.hbm_to_vmem [thread:$0]  %s836_s2, 128, %s37_s16, [#allocation8], %s668_s24, %s668_s24, %s669_s25  }
  0x20   :  { %s670_s28 = smov [#allocation4]   ;;  %s671_s30 = smov [#allocation9]  }
  0x21   :  { %s27_s29 = sshll.u32 %s670_s28, 4  ;;  %s50_s9 = sshll.u32 %s671_s30, 4  ;;  %s28_s29 = int_to_ptr.vmem [resolvable:$true] %s27_s29  ;;  %s51_s9 = int_to_ptr.vmem [resolvable:$true] %s50_s9 }
  0x22   :  { %s568_s12 = scalar_lea.hbm %s835_s1, 64 }
  0x23   :  { %p569_p11 = scmp.ne.s32.totalorder %s835_s1, %s568_s12  ;;  %p572_p12 = scmp.lt.u32.totalorder %s568_s12, %s835_s1 }
  0x25   :  { %p574_p13 = pnand %p572_p12, %p569_p11 }
  0x27   :  { %577 = shalt.err (!%p574_p13)
}
  0x28   :  { %s578_s2 = scalar_lea.vmem %s28_s29, 64  ;;  %p583_p1 = scmp.lt.s32.totalorder %s28_s29, %s28_s29 }
  0x29   :  { %p579_p0 = scmp.ne.s32.totalorder %s28_s29, %s578_s2  ;;  %p584_p2 = scmp.lt.s32.totalorder %s578_s2, %s578_s2 }
  0x2b   :  { %p585_p3 = por %p584_p2, %p583_p1 }
  0x2d   :  { %p586_p4 = pnand %p585_p3, %p579_p0 }
  0x2f   :  { %589 = shalt.err (!%p586_p4)
}
  0x30   :  { %30 = dma.hbm_to_vmem [thread:$0]  %s835_s1, 64, %s28_s29, [#allocation5]  }
  0x31   :  { %s590_s21 = scalar_lea.hbm %s838_s4, 1024 }
  0x32   :  { %p591_p5 = scmp.ne.s32.totalorder %s838_s4, %s590_s21  ;;  %p594_p6 = scmp.lt.u32.totalorder %s590_s21, %s838_s4 }
  0x34   :  { %p596_p7 = pnand %p594_p6, %p591_p5 }
  0x36   :  { %599 = shalt.err (!%p596_p7)
}
  0x37   :  { %s600_s27 = scalar_lea.vmem %s51_s9, 1024  ;;  %p605_p9 = scmp.lt.s32.totalorder %s51_s9, %s51_s9 }
  0x38   :  { %p601_p8 = scmp.ne.s32.totalorder %s51_s9, %s600_s27  ;;  %p606_p10 = scmp.lt.s32.totalorder %s600_s27, %s600_s27 }
  0x3a   :  { %p607_p11 = por %p606_p10, %p605_p9 }
  0x3c   :  { %p608_p12 = pnand %p607_p11, %p601_p8 }
  0x3e   :  { %611 = shalt.err (!%p608_p12)
}
  0x3f   :  { %56 = dma.hbm_to_vmem [thread:$0]  %s838_s4, 1024, %s51_s9, [#allocation8], %s668_s24, %s668_s24, %s669_s25  }
  0x40   :  { %s672_s29 = smov [#allocation10]   ;;  %s612_s12 = scalar_lea.hbm %s840_s6, 1024 }
  0x41   :  { %s64_s30 = sshll.u32 %s672_s29, 4  ;;  %p613_p13 = scmp.ne.s32.totalorder %s840_s6, %s612_s12  ;;  %s65_s30 = int_to_ptr.vmem [resolvable:$true] %s64_s30 }
  0x42   :  { %p616_p0 = scmp.lt.u32.totalorder %s612_s12, %s840_s6 }
  0x44   :  { %p618_p1 = pnand %p616_p0, %p613_p13 }
  0x46   :  { %621 = shalt.err (!%p618_p1)
}
  0x47   :  { %s622_s2 = scalar_lea.vmem %s65_s30, 1024  ;;  %p627_p3 = scmp.lt.s32.totalorder %s65_s30, %s65_s30 }
  0x48   :  { %p623_p2 = scmp.ne.s32.totalorder %s65_s30, %s622_s2  ;;  %p628_p4 = scmp.lt.s32.totalorder %s622_s2, %s622_s2 }
  0x4a   :  { %p629_p5 = por %p628_p4, %p627_p3 }
  0x4c   :  { %p630_p6 = pnand %p629_p5, %p623_p2 }
  0x4e   :  { %633 = shalt.err (!%p630_p6)
}
  0x4f   :  { %70 = dma.hbm_to_vmem [thread:$0]  %s840_s6, 1024, %s65_s30, [#allocation11], %s668_s24, %s668_s24, %s669_s25  }
  0x50   :  { %658 = dma.done.wait [#allocation5], 64  }
  0x51   :  { %659 = vsyncadd [#allocation5], 4294967232 }
  0x52   :  { %660 = dma.done.wait [#allocation8], 1152  }
  0x53   :  { %661 = vsyncadd [#allocation8], 4294966144 }
  0x54   :  { %662 = dma.done.wait [#allocation11], 1024  }
  0x55   :  { %663 = vsyncadd [#allocation11], 4294966272  ;;  %v673_v0 = vmov 0.0   ;;  %vm674_vm0 = vmmov 0   ;;  %s88_s16 = sld [smem:[#allocation3]]  ;;  %v519_v1 = vld [vmem:[#allocation7] sm:$0xff]  }
  0x56   :  { %460 = vmatprep.subr.bf16.mxu0 %v673_v0  ;;  %462 = vmatprep.mubr.msk.bf16.mxu0 %vm674_vm0, %v673_v0  ;;  %v86_v2 = vld [vmem:[#allocation4] sm:$0xf]  ;;  %v520_v5 = vld [vmem:[#allocation9] sm:$0xff]   ;;  %v521_v7 = vld [vmem:[#allocation9 + $0x8] sm:$0xff]   ;;  %vm103_vm1 = vcmask 130048   ;;  %s418_s6 = sld [smem:[#allocation3 + $0x1]] }
  0x57   :  { %466 = vmatprep.subr.bf16.mxu1 %v673_v0  ;;  %482 = vmatprep.mubr.msk.bf16.mxu1 %vm674_vm0, %v673_v0  ;;  %v87_v4 = vunpack.c.l.bf16 %v86_v2  ;;  %v522_v10 = vld [vmem:[#allocation9 + $0x10] sm:$0xff]   ;;  %v523_v12 = vld [vmem:[#allocation9 + $0x18] sm:$0xff]   ;;  %v524_v14 = vld [vmem:[#allocation9 + $0x20] sm:$0xff]   ;;  %s438_s20 = sld [smem:[#allocation3 + $0x3]]  ;;  %s675_s0 = smov [#allocation12]  }
  0x58   :  { %461 = vmatpush3.bf16.msra.mxu0 %v519_v1  ;;  %467 = vmatpush3.bf16.msra.mxu1 %v520_v5  ;;  %v525_v15 = vld [vmem:[#allocation9 + $0x28] sm:$0xff]   ;;  %v526_v16 = vld [vmem:[#allocation9 + $0x30] sm:$0xff]   ;;  %v527_v17 = vld [vmem:[#allocation9 + $0x38] sm:$0xff]  }
  0x59   :  { %486 = vmatprep.subr.bf16.mxu0 %v673_v0  ;;  %468 = vmatprep.subr.bf16.mxu1 %v673_v0  ;;  %v528_v18 = vld [vmem:[#allocation10] sm:$0xff]   ;;  %v529_v19 = vld [vmem:[#allocation10 + $0x8] sm:$0xff]   ;;  %v530_v20 = vld [vmem:[#allocation10 + $0x10] sm:$0xff]  }
  0x5a   :  { %v531_v21 = vld [vmem:[#allocation10 + $0x18] sm:$0xff]   ;;  %v419_v24 = vld [vmem:[%s837_s3] ss:$0 sm:$0xff]  ;;  %v532_v35 = vld [vmem:[#allocation10 + $0x20] sm:$0xff]   ;;  %s428_s3 = sld [smem:[#allocation3 + $0x2]] }
  0x5b   :  { %v89_v3 = vstv %s88_s16  ;;  %v533_v36 = vld [vmem:[#allocation10 + $0x28] sm:$0xff]   ;;  %v534_v37 = vld [vmem:[#allocation10 + $0x30] sm:$0xff]   ;;  %v535_v38 = vld [vmem:[#allocation10 + $0x38] sm:$0xff]  }
  0x5c   :  { %v90_v6 = vmul.f32 %v89_v3, %v87_v4  ;;  %469 = vmatpush3.bf16.msra.mxu1 %v521_v7  ;;  %v148_v22 = vstv %s418_s6  ;;  %v429_v41 = vld [vmem:[%s839_s5] ss:$0 sm:$0xff]  ;;  %s405_s5 = sshll.u32 %s675_s0, 4  ;;  %s406_s5 = int_to_ptr.vmem [resolvable:$true] %s405_s5 }
  0x5d   :  { %470 = vmatprep.subr.bf16.mxu1 %v673_v0  ;;  %v388_v52 = vstv %s438_s20  ;;  %v439_v54 = vld [vmem:[%s841_s7] ss:$0 sm:$0xff]  ;;  %s634_s23 = scalar_lea.vmem %s406_s5, 128  ;;  %p639_p8 = scmp.lt.s32.totalorder %s406_s5, %s406_s5 }
  0x5e   :  { %v506_v8 = vround.rtne.f32 %v90_v6  ;;  %p635_p7 = scmp.ne.s32.totalorder %s406_s5, %s634_s23  ;;  %p640_p9 = scmp.lt.s32.totalorder %s634_s23, %s634_s23 }
  0x60   :  { %v92_v9 = vmax.f32 %v506_v8, -4.0  ;;  %471 = vmatpush3.bf16.msra.mxu1 %v522_v10  ;;  %v268_v39 = vstv %s428_s3  ;;  %p641_p10 = por %p640_p9, %p639_p8 }
  0x61   :  { %472 = vmatprep.subr.bf16.mxu1 %v673_v0 }
  0x62   :  { %v93_v11 = vmin.f32 %v92_v9, 3.0  ;;  %p642_p11 = pnand %p641_p10, %p635_p7 }
  0x64   :  { %v94_v13 = vpack.c.bf16 %v93_v11, %v93_v11  ;;  %473 = vmatpush3.bf16.msra.mxu1 %v523_v12 }
  0x65   :  { %474 = vmatprep.subr.bf16.mxu1 %v673_v0 }
  0x66   :  { %463 = vmatmul.mubr.msk.bf16.vlgmr.msra.gmra.mrb[0].mxu0 %vm103_vm1, %v94_v13 }
  0x67   :  { %502 = vmatprep.mubr.msk.bf16.mxu0 %vm674_vm0, %v673_v0  ;;  %487 = vmatpush3.bf16.msra.mxu0 %v528_v18 }
  0x68   :  { %475 = vmatpush3.bf16.msra.mxu1 %v524_v14  ;;  %488 = vmatprep.subr.bf16.mxu0 %v673_v0 }
  0x69   :  { %476 = vmatprep.subr.bf16.mxu1 %v673_v0 }
  0x6b   :  { %489 = vmatpush3.bf16.msra.mxu0 %v529_v19 }
  0x6c   :  { %477 = vmatpush3.bf16.msra.mxu1 %v525_v15  ;;  %490 = vmatprep.subr.bf16.mxu0 %v673_v0 }
  0x6d   :  { %478 = vmatprep.subr.bf16.mxu1 %v673_v0 }
  0x6f   :  { %491 = vmatpush3.bf16.msra.mxu0 %v530_v20 }
  0x70   :  { %479 = vmatpush3.bf16.msra.mxu1 %v526_v16  ;;  %492 = vmatprep.subr.bf16.mxu0 %v673_v0 }
  0x71   :  { %480 = vmatprep.subr.bf16.mxu1 %v673_v0 }
  0x73   :  { %493 = vmatpush3.bf16.msra.mxu0 %v531_v21 }
  0x74   :  { %481 = vmatpush3.bf16.msra.mxu1 %v527_v17  ;;  %494 = vmatprep.subr.bf16.mxu0 %v673_v0 }
  0x77   :  { %495 = vmatpush3.bf16.msra.mxu0 %v532_v35 }
  0x78   :  { %496 = vmatprep.subr.bf16.mxu0 %v673_v0 }
  0x7b   :  { %497 = vmatpush3.bf16.msra.mxu0 %v533_v36 }
  0x7c   :  { %498 = vmatprep.subr.bf16.mxu0 %v673_v0 }
  0x7f   :  { %499 = vmatpush3.bf16.msra.mxu0 %v534_v37 }
  0x80   :  { %500 = vmatprep.subr.bf16.mxu0 %v673_v0 }
  0x83   :  { %501 = vmatpush3.bf16.msra.mxu0 %v535_v38 }
 0x139   :  { %v141_v23 = vpop.f32.mrb[0].mxu0 }
 0x13a   :  { %v149_v25 = vmul.f32 %v148_v22, %v141_v23  ;;  %v464_v26 = vpop.f32.mrb[1].mxu0 }
 0x13b   :  { %v144_v27 = vpop.f32.mrb[2].mxu0 }
 0x13c   :  { %v157_v28 = vadd.f32 %v419_v24, %v149_v25  ;;  %v465_v29 = vpop.f32.mrb[3].mxu0 }
 0x13e   :  { %v158_v30 = vmax.f32 %v157_v28, 0.0 }
 0x140   :  { %v507_v31 = vround.rtne.f32 %v158_v30 }
 0x142   :  { %v160_v32 = vmax.f32 %v507_v31, -4.0 }
 0x144   :  { %v161_v33 = vmin.f32 %v160_v32, 3.0 }
 0x146   :  { %v162_v34 = vpack.c.bf16 %v161_v33, %v161_v33 }
 0x148   :  { %483 = vmatmul.mubr.bf16.vlgmr.msra.gmra.mrb[0].mxu1 %v162_v34 }
 0x21b   :  { %v261_v40 = vpop.f32.mrb[0].mxu1 }
 0x21c   :  { %v269_v42 = vmul.f32 %v268_v39, %v261_v40  ;;  %v484_v43 = vpop.f32.mrb[1].mxu1 }
 0x21d   :  { %v264_v44 = vpop.f32.mrb[2].mxu1 }
 0x21e   :  { %v277_v45 = vadd.f32 %v429_v41, %v269_v42  ;;  %v485_v46 = vpop.f32.mrb[3].mxu1 }
 0x220   :  { %v278_v47 = vmax.f32 %v277_v45, 0.0 }
 0x222   :  { %v508_v48 = vround.rtne.f32 %v278_v47 }
 0x224   :  { %v280_v49 = vmax.f32 %v508_v48, -4.0 }
 0x226   :  { %v281_v50 = vmin.f32 %v280_v49, 3.0 }
 0x228   :  { %v282_v51 = vpack.c.bf16 %v281_v50, %v281_v50 }
 0x22a   :  { %503 = vmatmul.mubr.bf16.vlgmr.msra.gmra.mrb[4].mxu0 %v282_v51 }
 0x2fd   :  { %v381_v53 = vpop.f32.mrb[4].mxu0 }
 0x2fe   :  { %v389_v55 = vmul.f32 %v388_v52, %v381_v53  ;;  %v504_v56 = vpop.f32.mrb[5].mxu0 }
 0x2ff   :  { %v384_v57 = vpop.f32.mrb[6].mxu0 }
 0x300   :  { %v397_v58 = vadd.f32 %v439_v54, %v389_v55  ;;  %v505_v59 = vpop.f32.mrb[7].mxu0 }
 0x302   :  { %398 = vst [vmem:[#allocation12] sm:$0xff] %v397_v58 }
 0x303   :  { %645 = shalt.err (!%p642_p11)
}
 0x304   :  { %s646_s7 = scalar_lea.hbm %s842_s8, 128 }
 0x305   :  { %p647_p12 = scmp.ne.s32.totalorder %s842_s8, %s646_s7  ;;  %p650_p13 = scmp.lt.u32.totalorder %s646_s7, %s842_s8 }
 0x307   :  { %p652_p0 = pnand %p650_p13, %p647_p12 }
 0x309   :  { %655 = shalt.err (!%p652_p0)
}
 0x30a   :  { %408 = dma.vmem_to_hbm [thread:$0]  %s406_s5, 128, %s842_s8, [#allocation6]  }
 0x30b   :  { %664 = dma.done.wait [#allocation6], 128  }
 0x30c   :  { %665 = vsyncadd [#allocation6], 4294967168 }
 0x30d   :  { %412 = vsyncpa [#allocation5], 1 }
 0x30e   :  { %413 = vsyncpa [#allocation8], 1 }
 0x30f   :  { %414 = vsyncpa [#allocation11], 1 }
 0x310   :  { %415 = vsyncpa [#allocation6], 1 }

</bundles_post_ra>
